<compile_context>
chip_gen: v6e
topology: v6e:2x2x1
jax: 0.10.0
libtpu: 0.0.40
codegen_flags: <defaults>
</compile_context>

<pallas_src>
import functools

import jax
import jax.numpy as jnp
from jax.experimental import pallas as pl
from jax.experimental.pallas import tpu as pltpu


def _round_up(v, m):
    return (v + m - 1) // m * m


def _pick_tile(total, candidates=(512, 256, 128)):
    for c in candidates:
        if total % c == 0:
            return c
    return total


def _gemm_bias_relu_kernel(x_ref, w_ref, b_ref, o_ref, acc_ref):
    # x_ref:   (tm, tk)  im2col LHS tile (K*K*Cin taps packed into the contraction dim)
    # w_ref:   (tk, tc)  conv weights with BN scale folded in
    # b_ref:   (1, tc)   folded BN bias (f32)
    # o_ref:   (tm, tc)  output tile (f32)
    # acc_ref: (tm, tc)  f32 accumulator scratch (VMEM)
    @pl.when(pl.program_id(2) == 0)
    def _():
        acc_ref[...] = jnp.zeros_like(acc_ref)

    acc_ref[...] += jnp.dot(x_ref[...], w_ref[...],
                            preferred_element_type=jnp.float32)

    @pl.when(pl.program_id(2) == pl.num_programs(2) - 1)
    def _():
        # Fused (folded) BN bias + ReLU epilogue, in f32.
        o_ref[...] = jnp.maximum(acc_ref[...] + b_ref[...], 0.0).astype(o_ref.dtype)


def conv_bn_relu_pallas(x_nchw, w_oihw, gamma, beta, run_mean, run_var,
                        *, stride=1, eps=1e-5, compute_dtype=jnp.bfloat16):
    """Fused Conv2d(bias=False, padding=K//2, stride) + BatchNorm2d(eval) + ReLU.

    x_nchw : (N, Cin, H, W)    float32
    w_oihw : (Cout, Cin, K, K) float32
    returns: (N, Cout, H_out, W_out) float32, PyTorch NCHW semantics.
    """
    N, Cin, H, W = x_nchw.shape
    Cout, _, K, _ = w_oihw.shape
    pad = K // 2
    # PyTorch output-size formula.
    H_out = (H + 2 * pad - K) // stride + 1
    W_out = (W + 2 * pad - K) // stride + 1

    LANES = 128

    # ---- fold BatchNorm (eval / running stats) into weights + bias -------------------
    scale = (gamma / jnp.sqrt(run_var + eps)).astype(jnp.float32)          # (Cout,)
    bias = (beta - run_mean * scale).astype(jnp.float32)                   # (Cout,)
    w_hwio = jnp.transpose(w_oihw, (2, 3, 1, 0)).astype(jnp.float32)       # K,K,Cin,Cout
    w_hwio = w_hwio * scale[None, None, None, :]                           # fold BN scale
    Kc = K * K * Cin
    w_mat = w_hwio.reshape(Kc, Cout)                                       # (K*K*Cin, Cout)

    # ---- im2col (tap-packed LHS): contraction dim carries K*K*Cin real values --------
    x_nhwc = jnp.transpose(x_nchw, (0, 2, 3, 1)).astype(jnp.float32)       # N,H,W,Cin
    x_pad = jnp.pad(x_nhwc, ((0, 0), (pad, pad), (pad, pad), (0, 0)))      # spatial halo
    taps = []
    for kh in range(K):
        for kw in range(K):
            taps.append(
                x_pad[:,
                      kh:kh + (H_out - 1) * stride + 1:stride,
                      kw:kw + (W_out - 1) * stride + 1:stride,
                      :])                                                  # (N,Ho,Wo,Cin)
    x_cols = jnp.concatenate(taps, axis=-1)                                # (N,Ho,Wo,Kc)

    # ---- pad to tile multiples --------------------------------------------------------
    M = N * H_out * W_out
    tm, tc = 128, 128                      # tc fixed at 128: contraction is only 128 deep
    M_p = _round_up(M, tm)
    Kc_p = _round_up(Kc, LANES)
    Cout_p = _round_up(Cout, tc)
    tk = _pick_tile(Kc_p)

    x_cols = x_cols.reshape(M, Kc)
    x_cols_p = jnp.pad(x_cols, ((0, M_p - M), (0, Kc_p - Kc))).astype(compute_dtype)
    w_p = jnp.pad(w_mat, ((0, Kc_p - Kc), (0, Cout_p - Cout))).astype(compute_dtype)
    b_p = jnp.pad(bias, (0, Cout_p - Cout)).reshape(1, Cout_p)             # f32

    grid = (M_p // tm, Cout_p // tc, Kc_p // tk)

    # VMEM limit sized from actual block bytes (double-buffered inputs/outputs + acc),
    # with headroom; safe on v5e/v6e (128 MiB) and v7x (64 MiB).
    isz = jnp.dtype(compute_dtype).itemsize
    block_bytes = (2 * (tm * tk * isz + tk * tc * isz + tc * 4 + tm * tc * 4)
                   + tm * tc * 4)
    vmem_limit = int(min(max(4 * block_bytes, 16 << 20), 96 << 20))

    out_p = pl.pallas_call(
        _gemm_bias_relu_kernel,
        out_shape=jax.ShapeDtypeStruct((M_p, Cout_p), jnp.float32),
        grid=grid,
        in_specs=[
            pl.BlockSpec((tm, tk), lambda i, j, k: (i, k)),
            pl.BlockSpec((tk, tc), lambda i, j, k: (k, j)),
            pl.BlockSpec((1, tc), lambda i, j, k: (0, j)),
        ],
        out_specs=pl.BlockSpec((tm, tc), lambda i, j, k: (i, j)),
        scratch_shapes=[pltpu.VMEM((tm, tc), jnp.float32)],
        compiler_params=pltpu.CompilerParams(
            dimension_semantics=("parallel", "parallel", "arbitrary"),
            vmem_limit_bytes=vmem_limit,
        ),
    )(x_cols_p, w_p, b_p)

    out = out_p[:M, :Cout].reshape(N, H_out, W_out, Cout)   # drop row/channel padding
    return jnp.transpose(out, (0, 3, 1, 2))                 # back to NCHW


def _reference(x_nchw, w_oihw, gamma, beta, run_mean, run_var, *, stride, eps=1e-5):
    pad = w_oihw.shape[-1] // 2
    y = jax.lax.conv_general_dilated(
        x_nchw, w_oihw,
        window_strides=(stride, stride),
        padding=[(pad, pad), (pad, pad)],
        dimension_numbers=("NCHW", "OIHW", "NCHW"),
    )
    y = (y - run_mean[None, :, None, None]) / jnp.sqrt(run_var[None, :, None, None] + eps)
    y = y * gamma[None, :, None, None] + beta[None, :, None, None]
    return jnp.maximum(y, 0.0)


if __name__ == "__main__":
    # Small shapes consistent with Conv_BN_ReLU(in_channel=4, out_channel=8, kernel=3, stride).
    N, Cin, H, W = 2, 4, 16, 16
    Cout, K = 8, 3

    key = jax.random.PRNGKey(0)
    kx, kw, kg, kb, km, kv = jax.random.split(key, 6)

    x = jax.random.normal(kx, (N, Cin, H, W), dtype=jnp.float32)
    w = jax.random.normal(kw, (Cout, Cin, K, K), dtype=jnp.float32) * 0.1
    gamma = 1.0 + 0.1 * jax.random.normal(kg, (Cout,), dtype=jnp.float32)
    beta = 0.1 * jax.random.normal(kb, (Cout,), dtype=jnp.float32)
    run_mean = 0.05 * jax.random.normal(km, (Cout,), dtype=jnp.float32)
    run_var = jnp.abs(jax.random.normal(kv, (Cout,), dtype=jnp.float32)) + 0.5

    # f32 matmul operands: tight check, both stride=1 and stride=2.
    for stride in (1, 2):
        fn = jax.jit(functools.partial(conv_bn_relu_pallas, stride=stride,
                                       compute_dtype=jnp.float32))
        out = jax.block_until_ready(fn(x, w, gamma, beta, run_mean, run_var))
        ref = _reference(x, w, gamma, beta, run_mean, run_var, stride=stride)
        assert out.shape == ref.shape, (stride, out.shape, ref.shape)
        err = float(jnp.max(jnp.abs(out - ref)))
        assert jnp.allclose(out, ref, rtol=5e-4, atol=5e-4), (stride, err)

    # Default bf16 matmul operands (f32 accumulate + f32 epilogue): looser tolerance.
    fn_bf16 = jax.jit(functools.partial(conv_bn_relu_pallas, stride=1))
    out_bf16 = jax.block_until_ready(fn_bf16(x, w, gamma, beta, run_mean, run_var))
    ref1 = _reference(x, w, gamma, beta, run_mean, run_var, stride=1)
    err_bf16 = float(jnp.max(jnp.abs(out_bf16 - ref1)))
    assert jnp.allclose(out_bf16, ref1, rtol=2e-2, atol=5e-2), err_bf16

    print("KERNEL_OK")
</pallas_src>

<mosaic_0001>
module attributes {stable_mosaic.version = 11 : i64} {
  func.func @_gemm_bias_relu_kernel(%arg0: i32, %arg1: i32, %arg2: i32, %arg3: memref<128x128xf32, #tpu.memory_space<vmem>>, %arg4: memref<128x128xf32, #tpu.memory_space<vmem>>, %arg5: memref<1x128xf32, #tpu.memory_space<vmem>>, %arg6: memref<128x128xf32, #tpu.memory_space<vmem>>, %arg7: memref<128x128xf32, #tpu.memory_space<vmem>>) attributes {dimension_semantics = [#tpu.dimension_semantics<parallel>, #tpu.dimension_semantics<parallel>, #tpu.dimension_semantics<arbitrary>], iteration_bounds = array<i64: 4, 1, 1>, scalar_prefetch = 0 : i64, scratch_operands = 1 : i64, tpu.core_type = #tpu.core_type<tc>, window_params = [{transform_indices = @transform_0, window_bounds = array<i64: 128, 128>}, {transform_indices = @transform_1, window_bounds = array<i64: 128, 128>}, {transform_indices = @transform_2, window_bounds = array<i64: 1, 128>}, {transform_indices = @transform_3, window_bounds = array<i64: 128, 128>}]} {
    %c0_i32 = arith.constant 0 : i32
    %0 = arith.cmpi eq, %arg2, %c0_i32 : i32
    %1 = arith.extui %0 : i1 to i32
    %c0_i32_0 = arith.constant 0 : i32
    %2 = arith.cmpi ne, %1, %c0_i32_0 : i32
    scf.if %2 {
      %cst_10 = arith.constant 0.000000e+00 : f32
      %12 = vector.broadcast %cst_10 : f32 to vector<128x128xf32>
      %c0_11 = arith.constant 0 : index
      %c0_12 = arith.constant 0 : index
      %13 = vector.load %arg7[%c0_11, %c0_12] : memref<128x128xf32, #tpu.memory_space<vmem>>, vector<128x128xf32>
      tpu.vector_store %arg7[%c0_11, %c0_12], %12 {strides = array<i32>} : memref<128x128xf32, #tpu.memory_space<vmem>>, vector<128x128xf32>,
    } else {
    }
    %c0 = arith.constant 0 : index
    %c0_1 = arith.constant 0 : index
    %3 = vector.load %arg7[%c0, %c0_1] : memref<128x128xf32, #tpu.memory_space<vmem>>, vector<128x128xf32>
    %c0_2 = arith.constant 0 : index
    %c0_3 = arith.constant 0 : index
    %4 = vector.load %arg3[%c0_2, %c0_3] : memref<128x128xf32, #tpu.memory_space<vmem>>, vector<128x128xf32>
    %c0_4 = arith.constant 0 : index
    %c0_5 = arith.constant 0 : index
    %5 = vector.load %arg4[%c0_4, %c0_5] : memref<128x128xf32, #tpu.memory_space<vmem>>, vector<128x128xf32>
    %cst = arith.constant dense<0.000000e+00> : vector<128x128xf32>
    %6 = tpu.matmul %4, %5, %cst {dimension_numbers = #tpu.dot_dimension_numbers<[1], [0], [0], [1], [0, 0, 1, 1], [], []>} : vector<128x128xf32>, vector<128x128xf32>, vector<128x128xf32> -> vector<128x128xf32>
    %7 = arith.addf %3, %6 : vector<128x128xf32>
    %c0_6 = arith.constant 0 : index
    %c0_7 = arith.constant 0 : index
    %8 = vector.load %arg7[%c0_6, %c0_7] : memref<128x128xf32, #tpu.memory_space<vmem>>, vector<128x128xf32>
    tpu.vector_store %arg7[%c0_6, %c0_7], %7 {strides = array<i32>} : memref<128x128xf32, #tpu.memory_space<vmem>>, vector<128x128xf32>,
    %c0_i32_8 = arith.constant 0 : i32
    %9 = arith.cmpi eq, %arg2, %c0_i32_8 : i32
    %10 = arith.extui %9 : i1 to i32
    %c0_i32_9 = arith.constant 0 : i32
    %11 = arith.cmpi ne, %10, %c0_i32_9 : i32
    scf.if %11 {
      %c0_10 = arith.constant 0 : index
      %c0_11 = arith.constant 0 : index
      %12 = vector.load %arg7[%c0_10, %c0_11] : memref<128x128xf32, #tpu.memory_space<vmem>>, vector<128x128xf32>
      %c0_12 = arith.constant 0 : index
      %c0_13 = arith.constant 0 : index
      %13 = vector.load %arg5[%c0_12, %c0_13] : memref<1x128xf32, #tpu.memory_space<vmem>>, vector<1x128xf32>
      %14 = vector.broadcast %13 : vector<1x128xf32> to vector<128x128xf32>
      %15 = arith.addf %12, %14 : vector<128x128xf32>
      %cst_14 = arith.constant 0.000000e+00 : f32
      %16 = vector.broadcast %cst_14 : f32 to vector<128x128xf32>
      %17 = arith.maximumf %15, %16 : vector<128x128xf32>
      %c0_15 = arith.constant 0 : index
      %c0_16 = arith.constant 0 : index
      %18 = vector.load %arg6[%c0_15, %c0_16] : memref<128x128xf32, #tpu.memory_space<vmem>>, vector<128x128xf32>
      tpu.vector_store %arg6[%c0_15, %c0_16], %17 {strides = array<i32>} : memref<128x128xf32, #tpu.memory_space<vmem>>, vector<128x128xf32>,
    } else {
    }
    return
  }
  func.func @transform_0(%arg0: i32, %arg1: i32, %arg2: i32) -> (i32, i32) {
    %c0_i32 = arith.constant 0 : i32
    return %arg0, %arg2 : i32, i32
  }
  func.func @transform_1(%arg0: i32, %arg1: i32, %arg2: i32) -> (i32, i32) {
    %c0_i32 = arith.constant 0 : i32
    return %arg2, %arg1 : i32, i32
  }
  func.func @transform_2(%arg0: i32, %arg1: i32, %arg2: i32) -> (i32, i32) {
    %c0_i32 = arith.constant 0 : i32
    %c0_i32_0 = arith.constant 0 : i32
    return %c0_i32, %arg1 : i32, i32
  }
  func.func @transform_3(%arg0: i32, %arg1: i32, %arg2: i32) -> (i32, i32) {
    %c0_i32 = arith.constant 0 : i32
    return %arg0, %arg1 : i32, i32
  }
}

</mosaic_0001>

<bundles_post_ra>
// kernel: conv_bn_relu_pallas.1
= control target key start
LH: loop header
LB: loop body
LE: loop exit
PB: predicated region body
PF: predicated region fallthrough
CT: control target
= control target key end

     0   :  { %s891_s12 = smov 0   ;;  %s893_s13 = smov 0   ;;  %s1021_s0 = inlined_call_operand.vmem [shape: f32[512,128], index: 0, kind: input, shape index: {}]   ;;  %s1022_s1 = inlined_call_operand.vmem [shape: f32[128,128], index: 1, kind: input, shape index: {}]   ;;  %s1023_s2 = inlined_call_operand.vmem [shape: f32[1,128], index: 2, kind: input, shape index: {}]   ;;  %s1024_s3 = inlined_call_operand.vmem [shape: f32[512,128], index: 3, kind: output, shape index: {}]  }
   0x1   :  { %s895_s14 = smov 0  }
   0x2 LB: > { %s32_s15 = sadd.s32 1, %s865_s13  ;;  %p695_p0 = scmp.ge.s32.totalorder %s869_s14, 1  ;;  %s869_s14 = sphi %s895_s14, %s13_s14   ;;  %s865_s13 = sphi %s893_s13, %s1026_s13   ;;  %s861_s12 = sphi %s891_s12, %s1025_s12  }
   0x3   : > { %p34_p1 = scmp.ge.s32.totalorder %s32_s15, 4  ;;  %p188_p2 = scmp.lt.s32.totalorder %s869_s14, 5 }
   0x5   : > { %s1028_s15 = smov (%p34_p1, %s32_s15), 0  ;;  %p189_p3 = pnand %p695_p0, %p188_p2 }
   0x6   : > { %s696_s5 = sshll.u32 (!%p189_p3), %s861_s12, 4 }
   0x7   : > { %192 = sbr.rel (%p189_p3) target bundleno = 258 (0x102), region = 32  ;;  %p230_p4 = scmp.lt.s32.totalorder (!%p189_p3), %s696_s5, 63 }
   0xc   : > { %v326_v0 = vld [vmem:[%s1022_s1 + $0x78] sm:$0xff]  ;;  %v325_v1 = vld [vmem:[%s1022_s1 + $0x70] sm:$0xff]  ;;  %v324_v2 = vld [vmem:[%s1022_s1 + $0x68] sm:$0xff]  ;;  %s1030_s5 = smov (!%p230_p4, %s696_s5), 63 }
   0xd   : > { %735 = vmatprep.subr.mxu0 %v326_v0  ;;  %791 = vmatprep.subr.mxu1 %v326_v0  ;;  %v323_v3 = vld [vmem:[%s1022_s1 + $0x60] sm:$0xff]  ;;  %v322_v4 = vld [vmem:[%s1022_s1 + $0x58] sm:$0xff]  ;;  %v321_v5 = vld [vmem:[%s1022_s1 + $0x50] sm:$0xff]  ;;  %s697_s21 = sshll.u32 %s1030_s5, 3 }
   0xe   : > { %736 = vmatpush3.msra.mxu0 %v326_v0  ;;  %807 = vmatpush3.msra.mxu1 %v326_v0  ;;  %v320_v6 = vld [vmem:[%s1022_s1 + $0x48] sm:$0xff]  ;;  %v319_v7 = vld [vmem:[%s1022_s1 + $0x40] sm:$0xff]  ;;  %v318_v8 = vld [vmem:[%s1022_s1 + $0x38] sm:$0xff]  ;;  %s965_s26 = scalar_lea.vmem %s1021_s0, %s697_s21  ;;  %s994_s7 = scalar_lea.vmem %s1024_s3, %s697_s21 }
   0xf   : > { %737 = vmatprep.subr.mxu0 %v325_v1  ;;  %792 = vmatprep.subr.mxu1 %v325_v1  ;;  %v317_v9 = vld [vmem:[%s1022_s1 + $0x30] sm:$0xff]  ;;  %v316_v10 = vld [vmem:[%s1022_s1 + $0x28] sm:$0xff]  ;;  %v315_v11 = vld [vmem:[%s1022_s1 + $0x20] sm:$0xff] }
  0x10   : > { %738 = vmatpush3.msra.mxu0 %v325_v1  ;;  %808 = vmatpush3.msra.mxu1 %v325_v1  ;;  %v314_v12 = vld [vmem:[%s1022_s1 + $0x18] sm:$0xff]  ;;  %v313_v13 = vld [vmem:[%s1022_s1 + $0x10] sm:$0xff]  ;;  %v312_v14 = vld [vmem:[%s1022_s1 + $0x8] sm:$0xff] }
  0x11   : > { %739 = vmatprep.subr.mxu0 %v324_v2  ;;  %793 = vmatprep.subr.mxu1 %v324_v2  ;;  %v311_v15 = vld [vmem:[%s1022_s1] sm:$0xff]  ;;  %v296_v18 = vld [vmem:[%s965_s26 + $0x8] sm:$0xff]  ;;  %v297_v20 = vld [vmem:[%s965_s26 + $0x10] sm:$0xff] }
  0x12   : > { %740 = vmatpush3.msra.mxu0 %v324_v2  ;;  %809 = vmatpush3.msra.mxu1 %v324_v2  ;;  %v295_v16 = vld [vmem:[%s965_s26] sm:$0xff]  ;;  %v304_v19 = vld [vmem:[%s965_s26 + $0x48] sm:$0xff]  ;;  %v305_v21 = vld [vmem:[%s965_s26 + $0x50] sm:$0xff] }
  0x13   : > { %741 = vmatprep.subr.mxu0 %v323_v3  ;;  %794 = vmatprep.subr.mxu1 %v323_v3  ;;  %v303_v17 = vld [vmem:[%s965_s26 + $0x40] sm:$0xff]  ;;  %v298_v22 = vld [vmem:[%s965_s26 + $0x18] sm:$0xff]  ;;  %v300_v26 = vld [vmem:[%s965_s26 + $0x28] sm:$0xff] }
  0x14   : > { %742 = vmatpush3.msra.mxu0 %v323_v3  ;;  %810 = vmatpush3.msra.mxu1 %v323_v3  ;;  %v306_v23 = vld [vmem:[%s965_s26 + $0x58] sm:$0xff]  ;;  %v299_v24 = vld [vmem:[%s965_s26 + $0x20] sm:$0xff]  ;;  %v308_v27 = vld [vmem:[%s965_s26 + $0x68] sm:$0xff] }
  0x15   : > { %743 = vmatprep.subr.mxu0 %v322_v4  ;;  %795 = vmatprep.subr.mxu1 %v322_v4  ;;  %v307_v25 = vld [vmem:[%s965_s26 + $0x60] sm:$0xff]  ;;  %v301_v28 = vld [vmem:[%s965_s26 + $0x30] sm:$0xff]  ;;  %v302_v30 = vld [vmem:[%s965_s26 + $0x38] sm:$0xff] }
  0x16   : > { %744 = vmatpush3.msra.mxu0 %v322_v4  ;;  %811 = vmatpush3.msra.mxu1 %v322_v4  ;;  %v309_v29 = vld [vmem:[%s965_s26 + $0x70] sm:$0xff]  ;;  %v310_v31 = vld [vmem:[%s965_s26 + $0x78] sm:$0xff]  ;;  %v700_v32 = vld [vmem:[%s1023_s2] ss:$0 sm:$0xff] }
  0x17   : > { %745 = vmatprep.subr.mxu0 %v321_v5  ;;  %796 = vmatprep.subr.mxu1 %v321_v5 }
  0x18   : > { %746 = vmatpush3.msra.mxu0 %v321_v5  ;;  %812 = vmatpush3.msra.mxu1 %v321_v5 }
  0x19   : > { %747 = vmatprep.subr.mxu0 %v320_v6  ;;  %797 = vmatprep.subr.mxu1 %v320_v6 }
  0x1a   : > { %748 = vmatpush3.msra.mxu0 %v320_v6  ;;  %813 = vmatpush3.msra.mxu1 %v320_v6 }
  0x1b   : > { %749 = vmatprep.subr.mxu0 %v319_v7  ;;  %798 = vmatprep.subr.mxu1 %v319_v7 }
  0x1c   : > { %750 = vmatpush3.msra.mxu0 %v319_v7  ;;  %814 = vmatpush3.msra.mxu1 %v319_v7 }
  0x1d   : > { %751 = vmatprep.subr.mxu0 %v318_v8  ;;  %799 = vmatprep.subr.mxu1 %v318_v8 }
  0x1e   : > { %752 = vmatpush3.msra.mxu0 %v318_v8  ;;  %815 = vmatpush3.msra.mxu1 %v318_v8 }
  0x1f   : > { %753 = vmatprep.subr.mxu0 %v317_v9  ;;  %800 = vmatprep.subr.mxu1 %v317_v9 }
  0x20   : > { %754 = vmatpush3.msra.mxu0 %v317_v9  ;;  %816 = vmatpush3.msra.mxu1 %v317_v9 }
  0x21   : > { %755 = vmatprep.subr.mxu0 %v316_v10  ;;  %801 = vmatprep.subr.mxu1 %v316_v10 }
  0x22   : > { %756 = vmatpush3.msra.mxu0 %v316_v10  ;;  %817 = vmatpush3.msra.mxu1 %v316_v10 }
  0x23   : > { %757 = vmatprep.subr.mxu0 %v315_v11  ;;  %802 = vmatprep.subr.mxu1 %v315_v11 }
  0x24   : > { %758 = vmatpush3.msra.mxu0 %v315_v11  ;;  %818 = vmatpush3.msra.mxu1 %v315_v11 }
  0x25   : > { %759 = vmatprep.subr.mxu0 %v314_v12  ;;  %803 = vmatprep.subr.mxu1 %v314_v12 }
  0x26   : > { %760 = vmatpush3.msra.mxu0 %v314_v12  ;;  %819 = vmatpush3.msra.mxu1 %v314_v12 }
  0x27   : > { %761 = vmatprep.subr.mxu0 %v313_v13  ;;  %804 = vmatprep.subr.mxu1 %v313_v13 }
  0x28   : > { %762 = vmatpush3.msra.mxu0 %v313_v13  ;;  %820 = vmatpush3.msra.mxu1 %v313_v13 }
  0x29   : > { %763 = vmatprep.subr.mxu0 %v312_v14  ;;  %805 = vmatprep.subr.mxu1 %v312_v14 }
  0x2a   : > { %764 = vmatpush3.msra.mxu0 %v312_v14  ;;  %821 = vmatpush3.msra.mxu1 %v312_v14 }
  0x2b   : > { %765 = vmatprep.subr.mxu0 %v311_v15  ;;  %806 = vmatprep.subr.mxu1 %v311_v15 }
  0x2c   : > { %766 = vmatpush3.msra.mxu0 %v311_v15  ;;  %822 = vmatpush3.msra.mxu1 %v311_v15 }
  0x2d   : > { %767 = vmatprep.mubr.f32.mxu0 %v295_v16  ;;  %779 = vmatprep.mubr.f32.mxu1 %v303_v17 }
  0x2e   : > { %768 = vmatmul.mubr.f32.vlgmr.msra.gmra.mxu0 %v296_v18  ;;  %780 = vmatmul.mubr.f32.vlgmr.msra.gmra.mxu1 %v304_v19 }
  0x2f   : > { %770 = vmatprep.mubr.f32.mxu0 %v297_v20  ;;  %782 = vmatprep.mubr.f32.mxu1 %v305_v21 }
  0x32   : > { %771 = vmatmul.mubr.f32.gmra.mxu0 %v298_v22  ;;  %783 = vmatmul.mubr.f32.gmra.mxu1 %v306_v23 }
  0x33   : > { %773 = vmatprep.mubr.f32.mxu0 %v299_v24  ;;  %785 = vmatprep.mubr.f32.mxu1 %v307_v25 }
  0x36   : > { %774 = vmatmul.mubr.f32.gmra.mxu0 %v300_v26  ;;  %786 = vmatmul.mubr.f32.gmra.mxu1 %v308_v27 }
  0x37   : > { %776 = vmatprep.mubr.f32.mxu0 %v301_v28  ;;  %788 = vmatprep.mubr.f32.mxu1 %v309_v29 }
  0x3a   : > { %777 = vmatmul.mubr.f32.gmra.mxu0 %v302_v30  ;;  %789 = vmatmul.mubr.f32.gmra.mxu1 %v310_v31 }
  0xee   : > { %v769_v33 = vpop.f32.mrf.mxu0  ;;  %v781_v34 = vpop.f32.mrf.mxu1 }
  0xef   : > { %v531_v35 = vadd.f32 %v769_v33, %v700_v32  ;;  %v539_v36 = vadd.f32 %v781_v34, %v700_v32 }
  0xf0   : > { %v393_v37 = vpop.f32.mrf.mxu0  ;;  %v433_v38 = vpop.f32.mrf.mxu1 }
  0xf1   : > { %v547_v39 = vmax.f32 %v531_v35, 0.0  ;;  %v555_v40 = vmax.f32 %v539_v36, 0.0  ;;  %v530_v41 = vadd.f32 %v700_v32, %v393_v37  ;;  %v538_v42 = vadd.f32 %v700_v32, %v433_v38 }
  0xf2   : > { %v772_v43 = vpop.f32.mrf.mxu0  ;;  %v784_v44 = vpop.f32.mrf.mxu1 }
  0xf3   : > { %563 = vst [vmem:[%s994_s7 + $0x8] sm:$0xff] %v547_v39  ;;  %571 = vst [vmem:[%s994_s7 + $0x48] sm:$0xff] %v555_v40  ;;  %v546_v45 = vmax.f32 %v530_v41, 0.0  ;;  %v554_v46 = vmax.f32 %v538_v42, 0.0  ;;  %v533_v47 = vadd.f32 %v772_v43, %v700_v32  ;;  %v541_v48 = vadd.f32 %v784_v44, %v700_v32 }
  0xf4   : > { %v403_v49 = vpop.f32.mrf.mxu0  ;;  %v443_v50 = vpop.f32.mrf.mxu1 }
  0xf5   : > { %562 = vst [vmem:[%s994_s7] sm:$0xff] %v546_v45  ;;  %570 = vst [vmem:[%s994_s7 + $0x40] sm:$0xff] %v554_v46  ;;  %v549_v51 = vmax.f32 %v533_v47, 0.0  ;;  %v557_v52 = vmax.f32 %v541_v48, 0.0  ;;  %v532_v53 = vadd.f32 %v700_v32, %v403_v49  ;;  %v540_v54 = vadd.f32 %v700_v32, %v443_v50 }
  0xf6   : > { %v775_v55 = vpop.f32.mrf.mxu0  ;;  %v787_v56 = vpop.f32.mrf.mxu1 }
  0xf7   : > { %565 = vst [vmem:[%s994_s7 + $0x18] sm:$0xff] %v549_v51  ;;  %573 = vst [vmem:[%s994_s7 + $0x58] sm:$0xff] %v557_v52  ;;  %v548_v57 = vmax.f32 %v532_v53, 0.0  ;;  %v556_v58 = vmax.f32 %v540_v54, 0.0  ;;  %v535_v59 = vadd.f32 %v775_v55, %v700_v32  ;;  %v543_v60 = vadd.f32 %v787_v56, %v700_v32 }
  0xf8   : > { %v413_v61 = vpop.f32.mrf.mxu0  ;;  %v453_v62 = vpop.f32.mrf.mxu1 }
  0xf9   : > { %564 = vst [vmem:[%s994_s7 + $0x10] sm:$0xff] %v548_v57  ;;  %572 = vst [vmem:[%s994_s7 + $0x50] sm:$0xff] %v556_v58  ;;  %v551_v63 = vmax.f32 %v535_v59, 0.0  ;;  %v559_v0 = vmax.f32 %v543_v60, 0.0  ;;  %v534_v1 = vadd.f32 %v700_v32, %v413_v61  ;;  %v542_v2 = vadd.f32 %v700_v32, %v453_v62 }
  0xfa   : > { %v778_v3 = vpop.f32.mrf.mxu0  ;;  %v790_v4 = vpop.f32.mrf.mxu1 }
  0xfb   : > { %567 = vst [vmem:[%s994_s7 + $0x28] sm:$0xff] %v551_v63  ;;  %575 = vst [vmem:[%s994_s7 + $0x68] sm:$0xff] %v559_v0  ;;  %v550_v5 = vmax.f32 %v534_v1, 0.0  ;;  %v558_v6 = vmax.f32 %v542_v2, 0.0  ;;  %v537_v7 = vadd.f32 %v778_v3, %v700_v32  ;;  %v545_v8 = vadd.f32 %v790_v4, %v700_v32 }
  0xfc   : > { %v423_v9 = vpop.f32.mrf.mxu0  ;;  %v463_v10 = vpop.f32.mrf.mxu1 }
  0xfd   : > { %566 = vst [vmem:[%s994_s7 + $0x20] sm:$0xff] %v550_v5  ;;  %574 = vst [vmem:[%s994_s7 + $0x60] sm:$0xff] %v558_v6  ;;  %v553_v11 = vmax.f32 %v537_v7, 0.0  ;;  %v561_v12 = vmax.f32 %v545_v8, 0.0  ;;  %v536_v13 = vadd.f32 %v700_v32, %v423_v9  ;;  %v544_v14 = vadd.f32 %v700_v32, %v463_v10 }
  0xff   : > { %569 = vst [vmem:[%s994_s7 + $0x38] sm:$0xff] %v553_v11  ;;  %577 = vst [vmem:[%s994_s7 + $0x78] sm:$0xff] %v561_v12  ;;  %v552_v15 = vmax.f32 %v536_v13, 0.0  ;;  %v560_v16 = vmax.f32 %v544_v14, 0.0 }
 0x101   : > { %568 = vst [vmem:[%s994_s7 + $0x30] sm:$0xff] %v552_v15  ;;  %576 = vst [vmem:[%s994_s7 + $0x70] sm:$0xff] %v560_v16 }
 0x102 PF: > { %s13_s14 = sadd.s32 1, %s869_s14   ;;  %s1025_s12 = smov %s865_s13 }
 0x103   : > { %p10_p5 = scmp.ge.s32.totalorder %s13_s14, 6   ;;  %s1026_s13 = smov %s1028_s15 }
 0x105   :  { %12 = sbr.rel (!%p10_p5) target bundleno = 2 (0x2), region = 76 }

</bundles_post_ra>
